<compile_context>
chip_gen: v6e
topology: v6e:2x2x1
jax: 0.10.0
libtpu: 0.0.40
codegen_flags: <defaults>
</compile_context>

<pallas_src>
from functools import partial

import jax
import jax.numpy as jnp
from jax.experimental import pallas as pl
from jax.experimental.pallas import tpu as pltpu


def _round_up(x, m):
    return (x + m - 1) // m * m


def conv_stats_kernel(p_ref, w_ref, y_ref, stats_ref, acc_ref):
    """bf16 GEMM tile with f32 accumulation; last K step emits bf16 Y + per-tile
    channel sum / sum-of-squares (rows 0 / 1 of an (8, Cout_pad) stats block)."""
    k = pl.program_id(1)

    @pl.when(k == 0)
    def _():
        acc_ref[...] = jnp.zeros_like(acc_ref)

    acc_ref[...] += jnp.dot(p_ref[...], w_ref[...],
                            preferred_element_type=jnp.float32)

    @pl.when(k == pl.num_programs(1) - 1)
    def _():
        y = acc_ref[...]
        y_ref[...] = y.astype(y_ref.dtype)
        s = jnp.sum(y, axis=0, keepdims=True)        # (1, Cout_pad)
        sq = jnp.sum(y * y, axis=0, keepdims=True)   # (1, Cout_pad)
        row = jax.lax.broadcasted_iota(jnp.int32, stats_ref.shape, 0)
        stats_ref[...] = jnp.where(row == 0, s, jnp.where(row == 1, sq, 0.0))


def bn_act_kernel(y_ref, scale_ref, shift_ref, o_ref, *, slope):
    """Folded BatchNorm (y*scale + shift) + LeakyReLU. f32 math, bf16 input."""
    y = y_ref[...].astype(jnp.float32)
    y = y * scale_ref[...] + shift_ref[...]
    o_ref[...] = jnp.where(y >= 0.0, y, slope * y)


def dis_block_forward(x, conv_w, conv_b, gamma, beta, *,
                      stride=2, padding=1, eps=1e-5, slope=0.2,
                      tm_max=512, tk_max=2048):
    """x: (N, Cin, H, W) float32.  Returns (N, Cout, Ho, Wo) float32."""
    del conv_b  # exactly cancelled by training-mode BatchNorm mean subtraction
    N, Cin, H, W = x.shape
    Cout, _, KH, KW = conv_w.shape
    Ho = (H + 2 * padding - KH) // stride + 1
    Wo = (W + 2 * padding - KW) // stride + 1

    M = N * Ho * Wo
    K = Cin * KH * KW

    # ---- glue: XLA fused im2col, NHWC out => (M, K) reshape is layout-free ----
    patches = jax.lax.conv_general_dilated_patches(
        x.astype(jnp.bfloat16),
        filter_shape=(KH, KW),
        window_strides=(stride, stride),
        padding=((padding, padding), (padding, padding)),
        dimension_numbers=("NCHW", "OIHW", "NHWC"),
    )  # (N, Ho, Wo, Cin*KH*KW); feature order Cin-major then (kh, kw) = PyTorch reshape
    P = patches.reshape(M, K)
    W2 = conv_w.reshape(Cout, K).T.astype(jnp.bfloat16)          # (K, Cout)

    # ---- tiling + zero padding (zeros are exact no-ops for GEMM and stats) ----
    Cout_pad = _round_up(Cout, 128)
    tm = tm_max if M >= tm_max else _round_up(M, 8)
    M_pad = _round_up(M, tm)
    if K > tk_max:
        tk = tk_max
        K_pad = _round_up(K, tk)
    else:
        tk = _round_up(K, 128)
        K_pad = tk
    Mt, Kt = M_pad // tm, K_pad // tk

    P = jnp.pad(P, ((0, M_pad - M), (0, K_pad - K)))
    W2 = jnp.pad(W2, ((0, K_pad - K), (0, Cout_pad - Cout)))
    g_pad = jnp.pad(gamma.astype(jnp.float32), (0, Cout_pad - Cout))
    b_pad = jnp.pad(beta.astype(jnp.float32), (0, Cout_pad - Cout))

    # ---- kernel 1: conv-as-GEMM (bf16 x bf16 -> f32 acc) + per-tile stats ----
    y, stats = pl.pallas_call(
        conv_stats_kernel,
        out_shape=(jax.ShapeDtypeStruct((M_pad, Cout_pad), jnp.bfloat16),
                   jax.ShapeDtypeStruct((Mt * 8, Cout_pad), jnp.float32)),
        grid_spec=pltpu.PrefetchScalarGridSpec(
            num_scalar_prefetch=0, grid=(Mt, Kt),
            in_specs=[pl.BlockSpec((tm, tk), lambda i, k: (i, k)),
                      pl.BlockSpec((tk, Cout_pad), lambda i, k: (k, 0))],
            out_specs=(pl.BlockSpec((tm, Cout_pad), lambda i, k: (i, 0)),
                       pl.BlockSpec((8, Cout_pad), lambda i, k: (i, 0))),
            scratch_shapes=[pltpu.VMEM((tm, Cout_pad), jnp.float32)]),
        compiler_params=pltpu.CompilerParams(
            dimension_semantics=("parallel", "arbitrary")),
    )(P, W2)

    # ---- tiny (Cout,) reduction + BN scale/shift folding (plain JAX) ----
    stats = stats.reshape(Mt, 8, Cout_pad)
    ch_sum = stats[:, 0, :].sum(axis=0)
    ch_sq = stats[:, 1, :].sum(axis=0)
    count = float(M)  # padded rows of P are zero -> contribute 0 to both sums
    mean = ch_sum / count
    var = jnp.maximum(ch_sq / count - mean * mean, 0.0)  # biased var (PyTorch BN)
    scale = g_pad * jax.lax.rsqrt(var + eps)
    shift = b_pad - mean * scale
    scale2 = scale.reshape(1, Cout_pad)
    shift2 = shift.reshape(1, Cout_pad)

    # ---- kernel 2: folded BN + LeakyReLU (bf16 in, f32 math/out) ----
    out = pl.pallas_call(
        partial(bn_act_kernel, slope=slope),
        out_shape=jax.ShapeDtypeStruct((M_pad, Cout_pad), jnp.float32),
        grid_spec=pltpu.PrefetchScalarGridSpec(
            num_scalar_prefetch=0, grid=(Mt,),
            in_specs=[pl.BlockSpec((tm, Cout_pad), lambda i: (i, 0)),
                      pl.BlockSpec((1, Cout_pad), lambda i: (0, 0)),
                      pl.BlockSpec((1, Cout_pad), lambda i: (0, 0))],
            out_specs=pl.BlockSpec((tm, Cout_pad), lambda i: (i, 0))),
        compiler_params=pltpu.CompilerParams(
            dimension_semantics=("parallel",)),
    )(y, scale2, shift2)

    # ---- glue: drop padding, back to NCHW (module's external contract) ----
    # TODO(synk): keep the network NHWC end-to-end to avoid this per-block transpose.
    return out[:M, :Cout].reshape(N, Ho, Wo, Cout).transpose(0, 3, 1, 2)


def _reference(x, conv_w, conv_b, gamma, beta, *, stride=2, padding=1,
               eps=1e-5, slope=0.2):
    """Pure-JAX reference (conv + train-mode BN + LeakyReLU), with inputs
    quantized to bf16 to mirror the kernel's MXU operand precision."""
    xr = x.astype(jnp.bfloat16).astype(jnp.float32)
    wr = conv_w.astype(jnp.bfloat16).astype(jnp.float32)
    y = jax.lax.conv_general_dilated(
        xr, wr, window_strides=(stride, stride),
        padding=((padding, padding), (padding, padding)),
        dimension_numbers=("NCHW", "OIHW", "NCHW"))
    y = y + conv_b[None, :, None, None]   # cancelled by BN below (kept for fidelity)
    mean = y.mean(axis=(0, 2, 3), keepdims=True)
    var = ((y - mean) ** 2).mean(axis=(0, 2, 3), keepdims=True)
    y = (y - mean) * jax.lax.rsqrt(var + eps) * gamma[None, :, None, None] \
        + beta[None, :, None, None]
    return jnp.where(y >= 0.0, y, slope * y)


if __name__ == "__main__":
    key = jax.random.PRNGKey(0)
    k_x, k_w, k_b = jax.random.split(key, 3)

    N, Cin, H, W = 2, 4, 16, 16
    Cout, KH, KW = 8, 4, 4

    x = jax.random.normal(k_x, (N, Cin, H, W), dtype=jnp.float32)
    conv_w = 0.05 * jax.random.normal(k_w, (Cout, Cin, KH, KW), dtype=jnp.float32)
    conv_b = 0.01 * jax.random.normal(k_b, (Cout,), dtype=jnp.float32)
    gamma = jnp.ones((Cout,), dtype=jnp.float32)    # BatchNorm2d default init
    beta = jnp.zeros((Cout,), dtype=jnp.float32)

    out = dis_block_forward(x, conv_w, conv_b, gamma, beta)
    out = jax.block_until_ready(out)

    ref = _reference(x, conv_w, conv_b, gamma, beta)
    assert out.shape == (N, Cout, H // 2, W // 2)
    assert jnp.max(jnp.abs(out - ref)) < 3e-2, "mismatch vs JAX reference"

    print("KERNEL_OK")
</pallas_src>

<mosaic_0001>
module attributes {stable_mosaic.version = 11 : i64} {
  func.func @conv_stats_kernel(%arg0: i32, %arg1: i32, %arg2: memref<128x128xbf16, #tpu.memory_space<vmem>>, %arg3: memref<128x128xbf16, #tpu.memory_space<vmem>>, %arg4: memref<128x128xbf16, #tpu.memory_space<vmem>>, %arg5: memref<8x128xf32, #tpu.memory_space<vmem>>, %arg6: memref<128x128xf32, #tpu.memory_space<vmem>>) attributes {dimension_semantics = [#tpu.dimension_semantics<parallel>, #tpu.dimension_semantics<arbitrary>], iteration_bounds = array<i64: 1, 1>, scalar_prefetch = 0 : i64, scratch_operands = 1 : i64, tpu.core_type = #tpu.core_type<tc>, window_params = [{transform_indices = @transform_0, window_bounds = array<i64: 128, 128>}, {transform_indices = @transform_1, window_bounds = array<i64: 128, 128>}, {transform_indices = @transform_2, window_bounds = array<i64: 128, 128>}, {transform_indices = @transform_3, window_bounds = array<i64: 8, 128>}]} {
    %c0_i32 = arith.constant 0 : i32
    %0 = arith.cmpi eq, %arg1, %c0_i32 : i32
    %1 = arith.extui %0 : i1 to i32
    %c0_i32_0 = arith.constant 0 : i32
    %2 = arith.cmpi ne, %1, %c0_i32_0 : i32
    scf.if %2 {
      %cst_10 = arith.constant 0.000000e+00 : f32
      %12 = vector.broadcast %cst_10 : f32 to vector<128x128xf32>
      %c0_11 = arith.constant 0 : index
      %c0_12 = arith.constant 0 : index
      %13 = vector.load %arg6[%c0_11, %c0_12] : memref<128x128xf32, #tpu.memory_space<vmem>>, vector<128x128xf32>
      tpu.vector_store %arg6[%c0_11, %c0_12], %12 {strides = array<i32>} : memref<128x128xf32, #tpu.memory_space<vmem>>, vector<128x128xf32>,
    } else {
    }
    %c0 = arith.constant 0 : index
    %c0_1 = arith.constant 0 : index
    %3 = vector.load %arg6[%c0, %c0_1] : memref<128x128xf32, #tpu.memory_space<vmem>>, vector<128x128xf32>
    %c0_2 = arith.constant 0 : index
    %c0_3 = arith.constant 0 : index
    %4 = vector.load %arg2[%c0_2, %c0_3] : memref<128x128xbf16, #tpu.memory_space<vmem>>, vector<128x128xbf16>
    %c0_4 = arith.constant 0 : index
    %c0_5 = arith.constant 0 : index
    %5 = vector.load %arg3[%c0_4, %c0_5] : memref<128x128xbf16, #tpu.memory_space<vmem>>, vector<128x128xbf16>
    %cst = arith.constant dense<0.000000e+00> : vector<128x128xf32>
    %6 = tpu.matmul %4, %5, %cst {dimension_numbers = #tpu.dot_dimension_numbers<[1], [0], [0], [1], [0, 0, 1, 1], [], []>} : vector<128x128xbf16>, vector<128x128xbf16>, vector<128x128xf32> -> vector<128x128xf32>
    %7 = arith.addf %3, %6 : vector<128x128xf32>
    %c0_6 = arith.constant 0 : index
    %c0_7 = arith.constant 0 : index
    %8 = vector.load %arg6[%c0_6, %c0_7] : memref<128x128xf32, #tpu.memory_space<vmem>>, vector<128x128xf32>
    tpu.vector_store %arg6[%c0_6, %c0_7], %7 {strides = array<i32>} : memref<128x128xf32, #tpu.memory_space<vmem>>, vector<128x128xf32>,
    %c0_i32_8 = arith.constant 0 : i32
    %9 = arith.cmpi eq, %arg1, %c0_i32_8 : i32
    %10 = arith.extui %9 : i1 to i32
    %c0_i32_9 = arith.constant 0 : i32
    %11 = arith.cmpi ne, %10, %c0_i32_9 : i32
    scf.if %11 {
      %c0_10 = arith.constant 0 : index
      %c0_11 = arith.constant 0 : index
      %12 = vector.load %arg6[%c0_10, %c0_11] : memref<128x128xf32, #tpu.memory_space<vmem>>, vector<128x128xf32>
      %13 = arith.truncf %12 : vector<128x128xf32> to vector<128x128xbf16>
      %c0_12 = arith.constant 0 : index
      %c0_13 = arith.constant 0 : index
      %14 = vector.load %arg4[%c0_12, %c0_13] : memref<128x128xbf16, #tpu.memory_space<vmem>>, vector<128x128xbf16>
      tpu.vector_store %arg4[%c0_12, %c0_13], %13 {strides = array<i32>} : memref<128x128xbf16, #tpu.memory_space<vmem>>, vector<128x128xbf16>,
      %cst_14 = arith.constant dense<0.000000e+00> : vector<128xf32>
      %15 = vector.multi_reduction <add>, %12, %cst_14 [0] : vector<128x128xf32> to vector<128xf32>
      %16 = vector.shape_cast %15 : vector<128xf32> to vector<1x128xf32>
      %17 = arith.mulf %12, %12 : vector<128x128xf32>
      %cst_15 = arith.constant dense<0.000000e+00> : vector<128xf32>
      %18 = vector.multi_reduction <add>, %17, %cst_15 [0] : vector<128x128xf32> to vector<128xf32>
      %19 = vector.shape_cast %18 : vector<128xf32> to vector<1x128xf32>
      %20 = tpu.iota {dimensions = array<i32: 0>} : vector<8x128xi32>
      %c0_i32_16 = arith.constant 0 : i32
      %21 = vector.broadcast %c0_i32_16 : i32 to vector<8x128xi32>
      %22 = arith.cmpi eq, %20, %21 : vector<8x128xi32>
      %c1_i32 = arith.constant 1 : i32
      %23 = vector.broadcast %c1_i32 : i32 to vector<8x128xi32>
      %24 = arith.cmpi eq, %20, %23 : vector<8x128xi32>
      %cst_17 = arith.constant 0.000000e+00 : f32
      %25 = vector.shape_cast %19 : vector<1x128xf32> to vector<1x128xf32>
      %26 = vector.broadcast %25 : vector<1x128xf32> to vector<8x128xf32>
      %27 = vector.broadcast %cst_17 : f32 to vector<8x128xf32>
      %28 = arith.select %24, %26, %27 : vector<8x128xi1>, vector<8x128xf32>
      %29 = vector.shape_cast %16 : vector<1x128xf32> to vector<1x128xf32>
      %30 = vector.broadcast %29 : vector<1x128xf32> to vector<8x128xf32>
      %31 = arith.select %22, %30, %28 : vector<8x128xi1>, vector<8x128xf32>
      %c0_18 = arith.constant 0 : index
      %c0_19 = arith.constant 0 : index
      %32 = vector.load %arg5[%c0_18, %c0_19] : memref<8x128xf32, #tpu.memory_space<vmem>>, vector<8x128xf32>
      tpu.vector_store %arg5[%c0_18, %c0_19], %31 {strides = array<i32>} : memref<8x128xf32, #tpu.memory_space<vmem>>, vector<8x128xf32>,
    } else {
    }
    return
  }
  func.func @transform_0(%arg0: i32, %arg1: i32) -> (i32, i32) {
    %c0_i32 = arith.constant 0 : i32
    return %arg0, %arg1 : i32, i32
  }
  func.func @transform_1(%arg0: i32, %arg1: i32) -> (i32, i32) {
    %c0_i32 = arith.constant 0 : i32
    %c0_i32_0 = arith.constant 0 : i32
    return %arg1, %c0_i32 : i32, i32
  }
  func.func @transform_2(%arg0: i32, %arg1: i32) -> (i32, i32) {
    %c0_i32 = arith.constant 0 : i32
    %c0_i32_0 = arith.constant 0 : i32
    return %arg0, %c0_i32 : i32, i32
  }
  func.func @transform_3(%arg0: i32, %arg1: i32) -> (i32, i32) {
    %c0_i32 = arith.constant 0 : i32
    %c0_i32_0 = arith.constant 0 : i32
    return %arg0, %c0_i32 : i32, i32
  }
}

</mosaic_0001>

<bundles_post_ra>
// kernel: tpu_custom_call.1
= control target key start
LH: loop header
LB: loop body
LE: loop exit
PB: predicated region body
PF: predicated region fallthrough
CT: control target
= control target key end

     0   :  { %9 = vsyncpa [#allocation4], 0  ;;  %s873_s0 = inlined_call_operand.hbm [shape: bf16[128,128], index: 0, kind: input, shape index: {}]   ;;  %s874_s1 = inlined_call_operand.hbm [shape: bf16[128,128], index: 1, kind: input, shape index: {}]   ;;  %s875_s2 = inlined_call_operand.hbm [shape: bf16[128,128], index: 2, kind: output, shape index: {0}]   ;;  %s876_s3 = inlined_call_operand.hbm [shape: f32[8,128], index: 3, kind: output, shape index: {1}]  }
   0x1   :  { %10 = vsyncpa [#allocation7], 0 }
   0x2   :  { %11 = vsyncpa [#allocation5], 0 }
   0x3   :  { %12 = vsyncpa [#allocation10], 0  ;;  %s802_s12 = smov [#allocation3]  }
   0x4   :  { %s18_s13 = sshll.u32 %s802_s12, 4  ;;  %s19_s13 = int_to_ptr.vmem [resolvable:$true] %s18_s13 }
   0x5   :  { %s722_s14 = scalar_lea.vmem %s19_s13, 1024  ;;  %p727_p1 = scmp.lt.s32.totalorder %s19_s13, %s19_s13 }
   0x6   :  { %p723_p0 = scmp.ne.s32.totalorder %s19_s13, %s722_s14  ;;  %p728_p2 = scmp.lt.s32.totalorder %s722_s14, %s722_s14 }
   0x8   :  { %p729_p3 = por %p728_p2, %p727_p1 }
   0xa   :  { %p730_p4 = pnand %p729_p3, %p723_p0 }
   0xc   :  { %733 = shalt.err (!%p730_p4)
}
   0xd   :  { %s803_s15 = smov 64   ;;  %s804_s16 = smov 4  }
   0xe   :  { %24 = dma.hbm_to_vmem [thread:$0]  %s873_s0, 1024, %s19_s13, [#allocation4], %s803_s15, %s803_s15, %s804_s16  }
   0xf   :  { %s805_s19 = smov [#allocation6]  }
  0x10   :  { %s30_s20 = sshll.u32 %s805_s19, 4  ;;  %s31_s20 = int_to_ptr.vmem [resolvable:$true] %s30_s20 }
  0x11   :  { %s742_s21 = scalar_lea.vmem %s31_s20, 1024  ;;  %p747_p6 = scmp.lt.s32.totalorder %s31_s20, %s31_s20 }
  0x12   :  { %p743_p5 = scmp.ne.s32.totalorder %s31_s20, %s742_s21  ;;  %p748_p7 = scmp.lt.s32.totalorder %s742_s21, %s742_s21 }
  0x14   :  { %p749_p8 = por %p748_p7, %p747_p6 }
  0x16   :  { %p750_p9 = pnand %p749_p8, %p743_p5 }
  0x18   :  { %753 = shalt.err (!%p750_p9)
}
  0x19   :  { %36 = dma.hbm_to_vmem [thread:$0]  %s874_s1, 1024, %s31_s20, [#allocation7], %s803_s15, %s803_s15, %s804_s16  }
  0x1a   :  { %794 = dma.done.wait [#allocation4], 1024  }
  0x1b   :  { %795 = vsyncadd [#allocation4], 4294966272 }
  0x1c   :  { %796 = dma.done.wait [#allocation7], 1024  }
  0x1d   :  { %797 = vsyncadd [#allocation7], 4294966272  ;;  %v698_v0 = vld [vmem:[#allocation6 + $0x38] sm:$0xff]   ;;  %v699_v1 = vld [vmem:[#allocation6 + $0x30] sm:$0xff]   ;;  %s806_s0 = smov [#allocation8]  }
  0x1e   :  { %644 = vmatprep.subr.bf16.mxu0 %v698_v0  ;;  %676 = vmatprep.subr.bf16.mxu1 %v698_v0  ;;  %v700_v2 = vld [vmem:[#allocation6 + $0x28] sm:$0xff]   ;;  %v701_v3 = vld [vmem:[#allocation6 + $0x20] sm:$0xff]   ;;  %v702_v5 = vld [vmem:[#allocation6 + $0x18] sm:$0xff]   ;;  %s506_s1 = sshll.u32 %s806_s0, 4  ;;  %s507_s1 = int_to_ptr.vmem [resolvable:$true] %s506_s1 }
  0x1f   :  { %645 = vmatpush3.bf16.msra.mxu0 %v698_v0  ;;  %684 = vmatpush3.bf16.msra.mxu1 %v698_v0  ;;  %v706_v4 = vld [vmem:[#allocation3] sm:$0xff]   ;;  %v703_v7 = vld [vmem:[#allocation6 + $0x10] sm:$0xff]   ;;  %v704_v8 = vld [vmem:[#allocation6 + $0x8] sm:$0xff]   ;;  %s754_s24 = scalar_lea.vmem %s507_s1, 1024  ;;  %p759_p11 = scmp.lt.s32.totalorder %s507_s1, %s507_s1 }
  0x20   :  { %646 = vmatprep.subr.bf16.mxu0 %v699_v1  ;;  %677 = vmatprep.subr.bf16.mxu1 %v699_v1  ;;  %v710_v6 = vld [vmem:[#allocation3 + $0x20] sm:$0xff]   ;;  %v707_v10 = vld [vmem:[#allocation3 + $0x8] sm:$0xff]   ;;  %v708_v12 = vld [vmem:[#allocation3 + $0x10] sm:$0xff]   ;;  %p755_p10 = scmp.ne.s32.totalorder %s507_s1, %s754_s24  ;;  %p760_p12 = scmp.lt.s32.totalorder %s754_s24, %s754_s24 }
  0x21   :  { %660 = vmatprep.mubr.bf16.mxu0 %v706_v4  ;;  %668 = vmatprep.mubr.bf16.mxu1 %v710_v6  ;;  %v705_v9 = vld [vmem:[#allocation6] sm:$0xff]   ;;  %v711_v11 = vld [vmem:[#allocation3 + $0x28] sm:$0xff]   ;;  %v712_v13 = vld [vmem:[#allocation3 + $0x30] sm:$0xff]  }
  0x22   :  { %v709_v14 = vld [vmem:[#allocation3 + $0x18] sm:$0xff]   ;;  %p761_p13 = por %p760_p12, %p759_p11 }
  0x23   :  { %647 = vmatpush3.bf16.msra.mxu0 %v699_v1  ;;  %685 = vmatpush3.bf16.msra.mxu1 %v699_v1  ;;  %v713_v15 = vld [vmem:[#allocation3 + $0x38] sm:$0xff]  }
  0x24   :  { %648 = vmatprep.subr.bf16.mxu0 %v700_v2  ;;  %678 = vmatprep.subr.bf16.mxu1 %v700_v2  ;;  %p762_p0 = pnand %p761_p13, %p755_p10 }
  0x27   :  { %649 = vmatpush3.bf16.msra.mxu0 %v700_v2  ;;  %686 = vmatpush3.bf16.msra.mxu1 %v700_v2 }
  0x28   :  { %650 = vmatprep.subr.bf16.mxu0 %v701_v3  ;;  %679 = vmatprep.subr.bf16.mxu1 %v701_v3 }
  0x2b   :  { %651 = vmatpush3.bf16.msra.mxu0 %v701_v3  ;;  %687 = vmatpush3.bf16.msra.mxu1 %v701_v3 }
  0x2c   :  { %652 = vmatprep.subr.bf16.mxu0 %v702_v5  ;;  %680 = vmatprep.subr.bf16.mxu1 %v702_v5 }
  0x2f   :  { %653 = vmatpush3.bf16.msra.mxu0 %v702_v5  ;;  %688 = vmatpush3.bf16.msra.mxu1 %v702_v5 }
  0x30   :  { %654 = vmatprep.subr.bf16.mxu0 %v703_v7  ;;  %681 = vmatprep.subr.bf16.mxu1 %v703_v7 }
  0x33   :  { %655 = vmatpush3.bf16.msra.mxu0 %v703_v7  ;;  %689 = vmatpush3.bf16.msra.mxu1 %v703_v7 }
  0x34   :  { %656 = vmatprep.subr.bf16.mxu0 %v704_v8  ;;  %682 = vmatprep.subr.bf16.mxu1 %v704_v8 }
  0x37   :  { %657 = vmatpush3.bf16.msra.mxu0 %v704_v8  ;;  %690 = vmatpush3.bf16.msra.mxu1 %v704_v8 }
  0x38   :  { %658 = vmatprep.subr.bf16.mxu0 %v705_v9  ;;  %683 = vmatprep.subr.bf16.mxu1 %v705_v9 }
  0x3b   :  { %659 = vmatpush3.bf16.msra.mxu0 %v705_v9  ;;  %691 = vmatpush3.bf16.msra.mxu1 %v705_v9 }
  0x3e   :  { %661 = vmatmul.mubr.bf16.vlgmr.msra.gmra.mxu0 %v707_v10  ;;  %669 = vmatmul.mubr.bf16.vlgmr.msra.gmra.mxu1 %v711_v11 }
  0x3f   :  { %664 = vmatprep.mubr.bf16.mxu0 %v708_v12  ;;  %672 = vmatprep.mubr.bf16.mxu1 %v712_v13 }
  0x46   :  { %665 = vmatmul.mubr.bf16.gmra.mxu0 %v709_v14  ;;  %673 = vmatmul.mubr.bf16.gmra.mxu1 %v713_v15 }
  0xfe   :  { %v662_v16 = vpop.f32.mrf.mxu0  ;;  %v840_v17 = vpop.f32.mrf.mxu1 }
  0xff   :  { %v459_v33 = vmul.f32 %v662_v16, %v662_v16 }
 0x100   :  { %v242_v18 = vpop.f32.mrf.mxu0  ;;  %v842_v19 = vpop.f32.mrf.mxu1 }
 0x101   :  { %v457_v24 = vmul.f32 %v242_v18, %v242_v18 }
 0x102   :  { %v663_v20 = vpop.f32.mrf.mxu0  ;;  %v844_v21 = vpop.f32.mrf.mxu1 }
 0x103   :  { %v589_v22 = vpack.c.bf16 %v663_v20, %v662_v16  ;;  %v609_v23 = vpack.c.bf16 %v844_v21, %v840_v17  ;;  %v460_v38 = vmul.f32 %v663_v20, %v663_v20 }
 0x104   :  { %v245_v25 = vpop.f32.mrf.mxu0  ;;  %v277_v26 = vpop.f32.mrf.mxu1 }
 0x105   :  { %621 = vst [vmem:[#allocation8 + $0x8] sm:$0xff] %v589_v22   ;;  %v584_v27 = vpack.c.bf16 %v245_v25, %v242_v18  ;;  %v436_v28 = vadd.f32 %v245_v25, %v242_v18  ;;  %v458_v29 = vmul.f32 %v245_v25, %v245_v25  ;;  %625 = vst [vmem:[#allocation8 + $0x28] sm:$0xff] %v609_v23  }
 0x106   :  { %v604_v30 = vpack.c.bf16 %v277_v26, %v842_v19  ;;  %v666_v31 = vpop.f32.mrf.mxu0  ;;  %v849_v32 = vpop.f32.mrf.mxu1 }
 0x107   :  { %585 = vst [vmem:[#allocation8] sm:$0xff] %v584_v27   ;;  %v437_v34 = vadd.f32 %v662_v16, %v436_v28  ;;  %v473_v35 = vadd.f32 %v458_v29, %v457_v24  ;;  %v463_v55 = vmul.f32 %v666_v31, %v666_v31 }
 0x108   :  { %624 = vst [vmem:[#allocation8 + $0x20] sm:$0xff] %v604_v30   ;;  %v258_v36 = vpop.f32.mrf.mxu0  ;;  %v290_v37 = vpop.f32.mrf.mxu1 }
 0x109   :  { %v474_v39 = vadd.f32 %v473_v35, %v459_v33  ;;  %v438_v40 = vadd.f32 %v663_v20, %v437_v34  ;;  %v461_v44 = vmul.f32 %v258_v36, %v258_v36 }
 0x10a   :  { %v667_v41 = vpop.f32.mrf.mxu0  ;;  %v675_v42 = vpop.f32.mrf.mxu1 }
 0x10b   :  { %v439_v43 = vadd.f32 %v438_v40, %v258_v36  ;;  %v475_v45 = vadd.f32 %v474_v39, %v460_v38  ;;  %v599_v46 = vpack.c.bf16 %v667_v41, %v666_v31  ;;  %v619_v48 = vpack.c.bf16 %v675_v42, %v849_v32 }
 0x10c   :  { %v261_v47 = vpop.f32.mrf.mxu0  ;;  %v293_v49 = vpop.f32.mrf.mxu1  ;;  %v464_v58 = vmul.f32 %v667_v41, %v667_v41 }
 0x10d   :  { %v476_v50 = vadd.f32 %v475_v45, %v461_v44  ;;  %623 = vst [vmem:[#allocation8 + $0x18] sm:$0xff] %v599_v46   ;;  %v594_v51 = vpack.c.bf16 %v261_v47, %v258_v36  ;;  %v440_v52 = vadd.f32 %v439_v43, %v261_v47  ;;  %v462_v53 = vmul.f32 %v261_v47, %v261_v47 }
 0x10e   :  { %627 = vst [vmem:[#allocation8 + $0x38] sm:$0xff] %v619_v48   ;;  %v614_v54 = vpack.c.bf16 %v293_v49, %v290_v37 }
 0x10f   :  { %622 = vst [vmem:[#allocation8 + $0x10] sm:$0xff] %v594_v51   ;;  %v441_v56 = vadd.f32 %v666_v31, %v440_v52  ;;  %v477_v57 = vadd.f32 %v476_v50, %v462_v53 }
 0x110   :  { %626 = vst [vmem:[#allocation8 + $0x30] sm:$0xff] %v614_v54  }
 0x111   :  { %v442_v59 = vadd.f32 %v667_v41, %v441_v56  ;;  %v478_v60 = vadd.f32 %v477_v57, %v463_v55 }
 0x112   :  { %765 = shalt.err (!%p762_p0)
}
 0x113   :  { %512 = dma.vmem_to_hbm [thread:$0]  %s507_s1, 1024, %s875_s2, [#allocation5], %s803_s15, %s803_s15, %s804_s16   ;;  %v465_v61 = vmul.f32 %v842_v19, %v842_v19  ;;  %v479_v62 = vadd.f32 %v478_v60, %v464_v58  ;;  %v443_v63 = vadd.f32 %v442_v59, %v842_v19  ;;  %v466_v1 = vmul.f32 %v277_v26, %v277_v26 }
 0x114   :  { %v467_v3 = vmul.f32 %v840_v17, %v840_v17  ;;  %v468_v6 = vmul.f32 %v844_v21, %v844_v21  ;;  %v469_v10 = vmul.f32 %v290_v37, %v290_v37  ;;  %v470_v14 = vmul.f32 %v293_v49, %v293_v49  ;;  %s807_s2 = smov [#allocation9]  }
 0x115   :  { %v444_v0 = vadd.f32 %v443_v63, %v277_v26  ;;  %v480_v2 = vadd.f32 %v479_v62, %v465_v61  ;;  %v471_v15 = vmul.f32 %v849_v32, %v849_v32  ;;  %s519_s27 = sshll.u32 %s807_s2, 4  ;;  %s520_s27 = int_to_ptr.vmem [resolvable:$true] %s519_s27 }
 0x116   :  { %s774_s28 = scalar_lea.vmem %s520_s27, 128  ;;  %p779_p2 = scmp.lt.s32.totalorder %s520_s27, %s520_s27 }
 0x117   :  { %v445_v4 = vadd.f32 %v840_v17, %v444_v0  ;;  %v481_v5 = vadd.f32 %v480_v2, %v466_v1  ;;  %v472_v17 = vmul.f32 %v675_v42, %v675_v42  ;;  %p775_p1 = scmp.ne.s32.totalorder %s520_s27, %s774_s28  ;;  %p780_p3 = scmp.lt.s32.totalorder %s774_s28, %s774_s28 }
 0x119   :  { %v482_v7 = vadd.f32 %v481_v5, %v467_v3  ;;  %v446_v8 = vadd.f32 %v844_v21, %v445_v4  ;;  %v494_v21 = vlaneseq  ;;  %p781_p4 = por %p780_p3, %p779_p2 }
 0x11b   :  { %v447_v9 = vadd.f32 %v446_v8, %v290_v37  ;;  %v483_v11 = vadd.f32 %v482_v7, %v468_v6  ;;  %v495_v30 = vshrl.u32 %v494_v21, 7  ;;  %p782_p5 = pnand %p781_p4, %p775_p1 }
 0x11d   :  { %v484_v12 = vadd.f32 %v483_v11, %v469_v10  ;;  %v448_v13 = vadd.f32 %v447_v9, %v293_v49  ;;  %vm497_vm0 = vcmp.eq.s32.totalorder %v495_v30, 1  ;;  %vm496_vm1 = vcmp.eq.s32.totalorder %v495_v30, 0 }
 0x11f   :  { %v449_v16 = vadd.f32 %v849_v32, %v448_v13  ;;  %v485_v18 = vadd.f32 %v484_v12, %v470_v14 }
 0x121   :  { %v450_v19 = vadd.f32 %v675_v42, %v449_v16  ;;  %v486_v20 = vadd.f32 %v485_v18, %v471_v15 }
 0x123   :  { %v451_v22 = vrot.slane %v450_v19, 4  ;;  %v487_v23 = vadd.f32 %v486_v20, %v472_v17 }
 0x125   :  { %v452_v24 = vadd.f32 %v451_v22, %v450_v19  ;;  %v488_v25 = vrot.slane %v487_v23, 4 }
 0x127   :  { %v453_v26 = vrot.slane %v452_v24, 2  ;;  %v489_v27 = vadd.f32 %v488_v25, %v487_v23 }
 0x129   :  { %v454_v28 = vadd.f32 %v453_v26, %v452_v24  ;;  %v490_v29 = vrot.slane %v489_v27, 2 }
 0x12b   :  { %v491_v31 = vadd.f32 %v490_v29, %v489_v27  ;;  %v455_v33 = vrot.slane %v454_v28, 1 }
 0x12d   :  { %v492_v34 = vrot.slane %v491_v31, 1  ;;  %v456_v35 = vadd.f32 %v455_v33, %v454_v28 }
 0x12f   :  { %v493_v32 = vadd.f32 %v492_v34, %v491_v31 }
 0x131   :  { %v498_v36 = vsel %vm497_vm0, %v493_v32, 0.0 }
 0x132   :  { %v499_v37 = vsel %vm496_vm1, %v456_v35, %v498_v36 }
 0x133   :  { %500 = vst [vmem:[#allocation9] sm:$0xff] %v499_v37 }
 0x134   :  { %785 = shalt.err (!%p782_p5)
}
 0x135   :  { %522 = dma.vmem_to_hbm [thread:$0]  %s520_s27, 128, %s876_s3, [#allocation10]  }
 0x136   :  { %798 = dma.done.wait [#allocation5], 1024  }
 0x137   :  { %799 = vsyncadd [#allocation5], 4294966272 }
 0x138   :  { %800 = dma.done.wait [#allocation10], 128  }
 0x139   :  { %801 = vsyncadd [#allocation10], 4294967168 }
 0x13a   :  { %529 = vsyncpa [#allocation4], 1 }
 0x13b   :  { %530 = vsyncpa [#allocation7], 1 }
 0x13c   :  { %531 = vsyncpa [#allocation5], 1 }
 0x13d   :  { %532 = vsyncpa [#allocation10], 1 }

</bundles_post_ra>
